<compile_context>
chip_gen: v7x
topology: tpu7x:2x2x1
jax: 0.10.0
libtpu: 0.0.40
codegen_flags: <defaults>
</compile_context>

<pallas_src>
import functools

import jax
import jax.numpy as jnp
from jax.experimental import pallas as pl
from jax.experimental.pallas import tpu as pltpu

LANE = 128
STRIP_ROWS = 256                   # fold strip: (256, 128) f32 = 128 KiB
MAX_BLOCK_BYTES = 2 * 1024 * 1024  # per stream per grid step


def _round_up(n, m):
    return ((n + m - 1) // m) * m


def _hinge_d_kernel(real_ref, fake_ref, out_r_ref, out_f_ref, *,
                    nb_real, nb_fake, rows_real, rows_fake,
                    block_rows, strip_rows, blocks_per_core):
    c = pl.program_id(0)            # core / block-range index ("parallel")
    i = pl.program_id(1)            # block index within this core ("arbitrary")
    g = c * blocks_per_core + i     # global block index

    @pl.when(i == 0)
    def _init():
        out_r_ref[...] = jnp.zeros_like(out_r_ref)
        out_f_ref[...] = jnp.zeros_like(out_f_ref)

    def fold(src_ref, positive, row_limit):
        """Hinge + fold one (block_rows,128) block into an (8,128) f32 partial."""
        n_strips = block_rows // strip_rows

        def strip(s, acc):
            start = s * strip_rows
            if not isinstance(start, int):
                start = pl.multiple_of(start, strip_rows)
            x = src_ref[pl.ds(start, strip_rows), :].astype(jnp.float32)
            z = (1.0 - x) if positive else (1.0 + x)   # static sign, no vmul
            h = jnp.maximum(z, 0.0)
            if row_limit is not None:                  # tail block only
                rid = jax.lax.broadcasted_iota(
                    jnp.int32, (strip_rows, LANE), 0) + start
                h = jnp.where(rid < row_limit, h, 0.0)
            return acc + jnp.sum(h.reshape(strip_rows // 8, 8, LANE), axis=0)

        acc0 = jnp.zeros((8, LANE), jnp.float32)
        if n_strips == 1:
            return strip(0, acc0)
        return jax.lax.fori_loop(0, n_strips, strip, acc0, unroll=True)

    def stream(src_ref, out_ref, positive, nb, rows):
        last_rows = rows - (nb - 1) * block_rows
        partial = last_rows != block_rows         # static (Python) decision
        nb_full = nb - 1 if partial else nb
        if nb_full > 0:
            @pl.when(g < nb_full)
            def _full():                           # unmasked hot path
                out_ref[...] += fold(src_ref, positive, None)
        if partial:
            @pl.when(g == nb - 1)
            def _tail():                           # masked tail block
                out_ref[...] += fold(src_ref, positive, last_rows)

    stream(real_ref, out_r_ref, True, nb_real, rows_real)
    stream(fake_ref, out_f_ref, False, nb_fake, rows_fake)


def _as_lane_rows(x, neutral):
    """Flatten to (rows, 128). Free reshape when numel % 128 == 0; otherwise a
    hinge-neutral pad so padded elements contribute exactly 0."""
    flat = jnp.ravel(x)
    n = int(flat.shape[0])
    pad = (-n) % LANE
    if pad:
        # TODO(synk): this pad copies the tensor once when numel % 128 != 0; a
        # fully zero-copy path would need a manual 1-D aligned-prefix DMA plus
        # a wrapper-side tail reduction.
        flat = jnp.pad(flat, (0, pad), constant_values=neutral)
    return flat.reshape(-1, LANE), n


def hinge_gan_loss_discriminator(pred_real, pred_fake):
    """-min(0, real - 1).mean() - min(0, -fake - 1).mean()  (float32 scalar)."""
    real2d, n_real = _as_lane_rows(pred_real, neutral=1.0)
    fake2d, n_fake = _as_lane_rows(pred_fake, neutral=-1.0)

    rows_real, rows_fake = real2d.shape[0], fake2d.shape[0]
    max_rows = max(rows_real, rows_fake)
    itemsize = max(real2d.dtype.itemsize, fake2d.dtype.itemsize)

    # Block sizing: up to MAX_BLOCK_BYTES per stream (4096 rows f32, 8192 bf16);
    # a single right-sized block for small inputs.
    max_block_rows = max(
        STRIP_ROWS,
        (MAX_BLOCK_BYTES // (LANE * itemsize)) // STRIP_ROWS * STRIP_ROWS)
    if max_rows >= STRIP_ROWS:
        block_rows = min(max_block_rows, _round_up(max_rows, STRIP_ROWS))
        strip_rows = STRIP_ROWS
    else:
        block_rows = _round_up(max_rows, 8)
        strip_rows = block_rows

    nb_real = pl.cdiv(rows_real, block_rows)
    nb_fake = pl.cdiv(rows_fake, block_rows)
    total_blocks = max(nb_real, nb_fake)

    # Leading "parallel" axis -> both TensorCores on v7x; a harmless serial
    # outer loop on single-core v5e/v6e.
    num_cores = 2 if total_blocks >= 2 else 1
    bpc = pl.cdiv(total_blocks, num_cores)

    kernel = functools.partial(
        _hinge_d_kernel,
        nb_real=nb_real, nb_fake=nb_fake,
        rows_real=rows_real, rows_fake=rows_fake,
        block_rows=block_rows, strip_rows=strip_rows,
        blocks_per_core=bpc)

    # Clamp block indices so the shorter stream never DMAs past its extent;
    # Pallas skips the copy for an unchanged block index and the kernel gates
    # the compute for those steps with pl.when.
    real_map = lambda c, i: (jnp.minimum(c * bpc + i, nb_real - 1), 0)
    fake_map = lambda c, i: (jnp.minimum(c * bpc + i, nb_fake - 1), 0)

    block_bytes = block_rows * LANE * (real2d.dtype.itemsize +
                                       fake2d.dtype.itemsize)
    vmem_limit = int(min(32 << 20, max(16 << 20, 2 * block_bytes + (4 << 20))))

    out_real, out_fake = pl.pallas_call(
        kernel,
        out_shape=(jax.ShapeDtypeStruct((num_cores, 8, LANE), jnp.float32),
                   jax.ShapeDtypeStruct((num_cores, 8, LANE), jnp.float32)),
        grid_spec=pltpu.PrefetchScalarGridSpec(
            num_scalar_prefetch=0,
            grid=(num_cores, bpc),
            in_specs=[
                pl.BlockSpec((block_rows, LANE), real_map),
                pl.BlockSpec((block_rows, LANE), fake_map),
            ],
            out_specs=[
                pl.BlockSpec((None, 8, LANE), lambda c, i: (c, 0, 0)),
                pl.BlockSpec((None, 8, LANE), lambda c, i: (c, 0, 0)),
            ],
        ),
        compiler_params=pltpu.CompilerParams(
            dimension_semantics=("parallel", "arbitrary"),
            vmem_limit_bytes=vmem_limit),
    )(real2d, fake2d)

    # Tiny finalize in XLA: sum the per-core (8,128) partials, apply the means.
    return jnp.sum(out_real) / n_real + jnp.sum(out_fake) / n_fake


def _reference(pred_real, pred_fake):
    real = pred_real.astype(jnp.float32)
    fake = pred_fake.astype(jnp.float32)
    return (-jnp.minimum(0.0, real - 1.0).mean()
            - jnp.minimum(0.0, -fake - 1.0).mean())


if __name__ == "__main__":
    key = jax.random.PRNGKey(0)
    k1, k2 = jax.random.split(key)
    # Raw discriminator logits for real / fake samples, NCHW-style shape.
    pred_real = jax.random.normal(k1, (2, 4, 16, 16), dtype=jnp.float32)
    pred_fake = jax.random.normal(k2, (2, 4, 16, 16), dtype=jnp.float32)

    loss = hinge_gan_loss_discriminator(pred_real, pred_fake)
    loss = jax.block_until_ready(loss)

    ref = _reference(pred_real, pred_fake)
    assert jnp.allclose(loss, ref, rtol=1e-5, atol=1e-5), (loss, ref)
    print("KERNEL_OK")
</pallas_src>

<mosaic_0001>
module attributes {stable_mosaic.version = 11 : i64} {
  func.func @_hinge_d_kernel(%arg0: i32, %arg1: i32, %arg2: memref<16x128xf32, #tpu.memory_space<vmem>>, %arg3: memref<16x128xf32, #tpu.memory_space<vmem>>, %arg4: memref<1x8x128xf32, #tpu.memory_space<vmem>>, %arg5: memref<1x8x128xf32, #tpu.memory_space<vmem>>) attributes {dimension_semantics = [#tpu.dimension_semantics<parallel>, #tpu.dimension_semantics<arbitrary>], iteration_bounds = array<i64: 1, 1>, scalar_prefetch = 0 : i64, scratch_operands = 0 : i64, tpu.core_type = #tpu.core_type<tc>, window_params = [{transform_indices = @transform_0, window_bounds = array<i64: 16, 128>}, {transform_indices = @transform_1, window_bounds = array<i64: 16, 128>}, {transform_indices = @transform_2, window_bounds = array<i64: 1, 8, 128>}, {transform_indices = @transform_3, window_bounds = array<i64: 1, 8, 128>}]} {
    %c1_i32 = arith.constant 1 : i32
    %0 = arith.muli %arg0, %c1_i32 : i32
    %1 = arith.addi %0, %arg1 : i32
    %c0_i32 = arith.constant 0 : i32
    %2 = arith.cmpi eq, %arg1, %c0_i32 : i32
    %3 = arith.extui %2 : i1 to i32
    %c0_i32_0 = arith.constant 0 : i32
    %4 = arith.cmpi ne, %3, %c0_i32_0 : i32
    scf.if %4 {
      %cst = arith.constant 0.000000e+00 : f32
      %11 = vector.broadcast %cst : f32 to vector<8x128xf32>
      %c0 = arith.constant 0 : index
      %c0_5 = arith.constant 0 : index
      %c0_6 = arith.constant 0 : index
      %12 = vector.load %arg4[%c0, %c0_5, %c0_6] : memref<1x8x128xf32, #tpu.memory_space<vmem>>, vector<1x8x128xf32>
      %13 = vector.shape_cast %12 : vector<1x8x128xf32> to vector<8x128xf32>
      %14 = vector.shape_cast %11 : vector<8x128xf32> to vector<1x8x128xf32>
      tpu.vector_store %arg4[%c0, %c0_5, %c0_6], %14 {strides = array<i32>} : memref<1x8x128xf32, #tpu.memory_space<vmem>>, vector<1x8x128xf32>,
      %cst_7 = arith.constant 0.000000e+00 : f32
      %15 = vector.broadcast %cst_7 : f32 to vector<8x128xf32>
      %c0_8 = arith.constant 0 : index
      %c0_9 = arith.constant 0 : index
      %c0_10 = arith.constant 0 : index
      %16 = vector.load %arg5[%c0_8, %c0_9, %c0_10] : memref<1x8x128xf32, #tpu.memory_space<vmem>>, vector<1x8x128xf32>
      %17 = vector.shape_cast %16 : vector<1x8x128xf32> to vector<8x128xf32>
      %18 = vector.shape_cast %15 : vector<8x128xf32> to vector<1x8x128xf32>
      tpu.vector_store %arg5[%c0_8, %c0_9, %c0_10], %18 {strides = array<i32>} : memref<1x8x128xf32, #tpu.memory_space<vmem>>, vector<1x8x128xf32>,
    } else {
    }
    %c1_i32_1 = arith.constant 1 : i32
    %5 = arith.cmpi slt, %1, %c1_i32_1 : i32
    %6 = arith.extui %5 : i1 to i32
    %c0_i32_2 = arith.constant 0 : i32
    %7 = arith.cmpi ne, %6, %c0_i32_2 : i32
    scf.if %7 {
      %c0 = arith.constant 0 : index
      %c0_5 = arith.constant 0 : index
      %c0_6 = arith.constant 0 : index
      %11 = vector.load %arg4[%c0, %c0_5, %c0_6] : memref<1x8x128xf32, #tpu.memory_space<vmem>>, vector<1x8x128xf32>
      %12 = vector.shape_cast %11 : vector<1x8x128xf32> to vector<8x128xf32>
      %cst = arith.constant 0.000000e+00 : f32
      %13 = vector.broadcast %cst : f32 to vector<8x128xf32>
      %c0_7 = arith.constant 0 : index
      %c0_8 = arith.constant 0 : index
      %14 = vector.load %arg2[%c0_7, %c0_8] : memref<16x128xf32, #tpu.memory_space<vmem>>, vector<16x128xf32>
      %cst_9 = arith.constant 1.000000e+00 : f32
      %15 = vector.broadcast %cst_9 : f32 to vector<16x128xf32>
      %16 = arith.subf %15, %14 : vector<16x128xf32>
      %cst_10 = arith.constant 0.000000e+00 : f32
      %17 = vector.broadcast %cst_10 : f32 to vector<16x128xf32>
      %18 = arith.maximumf %16, %17 : vector<16x128xf32>
      %19 = vector.shape_cast %18 : vector<16x128xf32> to vector<2x8x128xf32>
      %cst_11 = arith.constant dense<0.000000e+00> : vector<8x128xf32>
      %20 = vector.multi_reduction <add>, %19, %cst_11 [0] : vector<2x8x128xf32> to vector<8x128xf32>
      %21 = arith.addf %13, %20 : vector<8x128xf32>
      %22 = arith.addf %12, %21 : vector<8x128xf32>
      %c0_12 = arith.constant 0 : index
      %c0_13 = arith.constant 0 : index
      %c0_14 = arith.constant 0 : index
      %23 = vector.load %arg4[%c0_12, %c0_13, %c0_14] : memref<1x8x128xf32, #tpu.memory_space<vmem>>, vector<1x8x128xf32>
      %24 = vector.shape_cast %23 : vector<1x8x128xf32> to vector<8x128xf32>
      %25 = vector.shape_cast %22 : vector<8x128xf32> to vector<1x8x128xf32>
      tpu.vector_store %arg4[%c0_12, %c0_13, %c0_14], %25 {strides = array<i32>} : memref<1x8x128xf32, #tpu.memory_space<vmem>>, vector<1x8x128xf32>,
    } else {
    }
    %c1_i32_3 = arith.constant 1 : i32
    %8 = arith.cmpi slt, %1, %c1_i32_3 : i32
    %9 = arith.extui %8 : i1 to i32
    %c0_i32_4 = arith.constant 0 : i32
    %10 = arith.cmpi ne, %9, %c0_i32_4 : i32
    scf.if %10 {
      %c0 = arith.constant 0 : index
      %c0_5 = arith.constant 0 : index
      %c0_6 = arith.constant 0 : index
      %11 = vector.load %arg5[%c0, %c0_5, %c0_6] : memref<1x8x128xf32, #tpu.memory_space<vmem>>, vector<1x8x128xf32>
      %12 = vector.shape_cast %11 : vector<1x8x128xf32> to vector<8x128xf32>
      %cst = arith.constant 0.000000e+00 : f32
      %13 = vector.broadcast %cst : f32 to vector<8x128xf32>
      %c0_7 = arith.constant 0 : index
      %c0_8 = arith.constant 0 : index
      %14 = vector.load %arg3[%c0_7, %c0_8] : memref<16x128xf32, #tpu.memory_space<vmem>>, vector<16x128xf32>
      %cst_9 = arith.constant 1.000000e+00 : f32
      %15 = vector.broadcast %cst_9 : f32 to vector<16x128xf32>
      %16 = arith.addf %15, %14 : vector<16x128xf32>
      %cst_10 = arith.constant 0.000000e+00 : f32
      %17 = vector.broadcast %cst_10 : f32 to vector<16x128xf32>
      %18 = arith.maximumf %16, %17 : vector<16x128xf32>
      %19 = vector.shape_cast %18 : vector<16x128xf32> to vector<2x8x128xf32>
      %cst_11 = arith.constant dense<0.000000e+00> : vector<8x128xf32>
      %20 = vector.multi_reduction <add>, %19, %cst_11 [0] : vector<2x8x128xf32> to vector<8x128xf32>
      %21 = arith.addf %13, %20 : vector<8x128xf32>
      %22 = arith.addf %12, %21 : vector<8x128xf32>
      %c0_12 = arith.constant 0 : index
      %c0_13 = arith.constant 0 : index
      %c0_14 = arith.constant 0 : index
      %23 = vector.load %arg5[%c0_12, %c0_13, %c0_14] : memref<1x8x128xf32, #tpu.memory_space<vmem>>, vector<1x8x128xf32>
      %24 = vector.shape_cast %23 : vector<1x8x128xf32> to vector<8x128xf32>
      %25 = vector.shape_cast %22 : vector<8x128xf32> to vector<1x8x128xf32>
      tpu.vector_store %arg5[%c0_12, %c0_13, %c0_14], %25 {strides = array<i32>} : memref<1x8x128xf32, #tpu.memory_space<vmem>>, vector<1x8x128xf32>,
    } else {
    }
    return
  }
  func.func @transform_0(%arg0: i32, %arg1: i32) -> (i32, i32) {
    %c1_i32 = arith.constant 1 : i32
    %0 = arith.muli %arg0, %c1_i32 : i32
    %1 = arith.addi %0, %arg1 : i32
    %c0_i32 = arith.constant 0 : i32
    %2 = arith.minsi %1, %c0_i32 : i32
    %c0_i32_0 = arith.constant 0 : i32
    %c0_i32_1 = arith.constant 0 : i32
    return %2, %c0_i32_0 : i32, i32
  }
  func.func @transform_1(%arg0: i32, %arg1: i32) -> (i32, i32) {
    %c1_i32 = arith.constant 1 : i32
    %0 = arith.muli %arg0, %c1_i32 : i32
    %1 = arith.addi %0, %arg1 : i32
    %c0_i32 = arith.constant 0 : i32
    %2 = arith.minsi %1, %c0_i32 : i32
    %c0_i32_0 = arith.constant 0 : i32
    %c0_i32_1 = arith.constant 0 : i32
    return %2, %c0_i32_0 : i32, i32
  }
  func.func @transform_2(%arg0: i32, %arg1: i32) -> (i32, i32, i32) {
    %c0_i32 = arith.constant 0 : i32
    %c0_i32_0 = arith.constant 0 : i32
    %c0_i32_1 = arith.constant 0 : i32
    return %arg0, %c0_i32, %c0_i32_0 : i32, i32, i32
  }
  func.func @transform_3(%arg0: i32, %arg1: i32) -> (i32, i32, i32) {
    %c0_i32 = arith.constant 0 : i32
    %c0_i32_0 = arith.constant 0 : i32
    %c0_i32_1 = arith.constant 0 : i32
    return %arg0, %c0_i32, %c0_i32_0 : i32, i32, i32
  }
}

</mosaic_0001>

<bundles_post_ra>
// kernel: tpu_custom_call.1
= control target key start
LH: loop header
LB: loop body
LE: loop exit
PB: predicated region body
PF: predicated region fallthrough
CT: control target
= control target key end

     0   :  { %9 = vsyncpa [#allocation3], 0  ;;  %s307_s0 = inlined_call_operand.hbm [shape: f32[16,128], index: 0, kind: input, shape index: {}]   ;;  %s308_s1 = inlined_call_operand.hbm [shape: f32[16,128], index: 1, kind: input, shape index: {}]   ;;  %s309_s2 = inlined_call_operand.hbm [shape: f32[1,8,128], index: 2, kind: output, shape index: {0}]   ;;  %s310_s3 = inlined_call_operand.hbm [shape: f32[1,8,128], index: 3, kind: output, shape index: {1}]  }
   0x1   :  { %10 = vsyncpa [#allocation6], 0 }
   0x2   :  { %11 = vsyncpa [#allocation4], 0 }
   0x3   :  { %12 = vsyncpa [#allocation9], 0  ;;  %s233_s12 = smov [#allocation2]   ;;  %s137_s16 = scalar_lea.hbm %s307_s0, 256 }
   0x4   :  { %s24_s13 = sshll.u32 %s233_s12, 4  ;;  %p138_p0 = scmp.ne.s32.totalorder %s307_s0, %s137_s16  ;;  %s25_s13 = int_to_ptr.vmem [resolvable:$true] %s24_s13 }
   0x5   :  { %p141_p1 = scmp.lt.u32.totalorder %s137_s16, %s307_s0 }
   0x7   :  { %p143_p2 = pnand %p141_p1, %p138_p0 }
   0x9   :  { %146 = shalt.err (!%p143_p2)
}
   0xa   :  { %s147_s21 = scalar_lea.vmem %s25_s13, 256  ;;  %p152_p4 = scmp.lt.s32.totalorder %s25_s13, %s25_s13 }
   0xb   :  { %p148_p3 = scmp.ne.s32.totalorder %s25_s13, %s147_s21  ;;  %p153_p5 = scmp.lt.s32.totalorder %s147_s21, %s147_s21 }
   0xd   :  { %p154_p6 = por %p153_p5, %p152_p4 }
   0xf   :  { %p155_p7 = pnand %p154_p6, %p148_p3 }
  0x11   :  { %158 = shalt.err (!%p155_p7)
}
  0x12   :  { %s234_s22 = smov 128   ;;  %s235_s23 = smov 8  }
  0x13   :  { %30 = dma.hbm_to_vmem [thread:$0]  %s307_s0, 256, %s25_s13, [#allocation3], %s234_s22, %s234_s22, %s235_s23  }
  0x14   :  { %s236_s26 = smov [#allocation5]   ;;  %s159_s30 = scalar_lea.hbm %s308_s1, 256 }
  0x15   :  { %s42_s27 = sshll.u32 %s236_s26, 4  ;;  %p160_p8 = scmp.ne.s32.totalorder %s308_s1, %s159_s30  ;;  %s43_s27 = int_to_ptr.vmem [resolvable:$true] %s42_s27 }
  0x16   :  { %p163_p9 = scmp.lt.u32.totalorder %s159_s30, %s308_s1 }
  0x18   :  { %p165_p10 = pnand %p163_p9, %p160_p8 }
  0x1a   :  { %168 = shalt.err (!%p165_p10)
}
  0x1b   :  { %s169_s8 = scalar_lea.vmem %s43_s27, 256  ;;  %p174_p12 = scmp.lt.s32.totalorder %s43_s27, %s43_s27 }
  0x1c   :  { %p170_p11 = scmp.ne.s32.totalorder %s43_s27, %s169_s8  ;;  %p175_p13 = scmp.lt.s32.totalorder %s169_s8, %s169_s8 }
  0x1e   :  { %p176_p0 = por %p175_p13, %p174_p12 }
  0x20   :  { %p177_p1 = pnand %p176_p0, %p170_p11 }
  0x22   :  { %180 = shalt.err (!%p177_p1)
}
  0x23   :  { %48 = dma.hbm_to_vmem [thread:$0]  %s308_s1, 256, %s43_s27, [#allocation6], %s234_s22, %s234_s22, %s235_s23  }
  0x24   :  { %225 = dma.done.wait [#allocation3], 256  }
  0x25   :  { %226 = vsyncadd [#allocation3], 4294967040 }
  0x26   :  { %227 = dma.done.wait [#allocation6], 256  }
  0x27   :  { %228 = vsyncadd [#allocation6], 4294967040  ;;  %v75_v0 = vld [vmem:[#allocation2] sm:$0xff]  ;;  %v76_v1 = vld [vmem:[#allocation2 + $0x8] sm:$0xff]  ;;  %s237_s10 = smov [#allocation7]   ;;  %s238_s1 = smov [#allocation8]  }
  0x28   :  { %v86_v2 = vld [vmem:[#allocation5] sm:$0xff]  ;;  %v77_v3 = vsub.f32 1.0, %v75_v0  ;;  %v78_v4 = vsub.f32 1.0, %v76_v1  ;;  %v87_v5 = vld [vmem:[#allocation5 + $0x8] sm:$0xff]  ;;  %s102_s11 = sshll.u32 %s237_s10, 4  ;;  %s112_s12 = sshll.u32 %s238_s1, 4  ;;  %s103_s11 = int_to_ptr.vmem [resolvable:$true] %s102_s11  ;;  %s113_s12 = int_to_ptr.vmem [resolvable:$true] %s112_s12 }
  0x29   :  { %v88_v6 = vadd.f32 1.0, %v86_v2  ;;  %v89_v7 = vadd.f32 1.0, %v87_v5  ;;  %s181_s13 = scalar_lea.vmem %s103_s11, 128  ;;  %p186_p3 = scmp.lt.s32.totalorder %s103_s11, %s103_s11 }
  0x2a   :  { %v79_v8 = vmax.f32 %v77_v3, 0.0  ;;  %v80_v9 = vmax.f32 %v78_v4, 0.0  ;;  %p182_p2 = scmp.ne.s32.totalorder %s103_s11, %s181_s13  ;;  %p187_p4 = scmp.lt.s32.totalorder %s181_s13, %s181_s13 }
  0x2b   :  { %v90_v10 = vmax.f32 %v88_v6, 0.0  ;;  %v91_v11 = vmax.f32 %v89_v7, 0.0 }
  0x2c   :  { %v81_v12 = vadd.f32 %v80_v9, %v79_v8  ;;  %p188_p5 = por %p187_p4, %p186_p3 }
  0x2d   :  { %v92_v13 = vadd.f32 %v91_v11, %v90_v10 }
  0x2e   :  { %84 = vst [vmem:[#allocation7] sm:$0xff] %v81_v12  ;;  %p189_p6 = pnand %p188_p5, %p182_p2 }
  0x2f   :  { %95 = vst [vmem:[#allocation8] sm:$0xff] %v92_v13 }
  0x30   :  { %192 = shalt.err (!%p189_p6)
}
  0x31   :  { %s193_s16 = scalar_lea.hbm %s309_s2, 128 }
  0x32   :  { %p194_p7 = scmp.ne.s32.totalorder %s309_s2, %s193_s16  ;;  %p197_p8 = scmp.lt.u32.totalorder %s193_s16, %s309_s2 }
  0x34   :  { %p199_p9 = pnand %p197_p8, %p194_p7 }
  0x36   :  { %202 = shalt.err (!%p199_p9)
}
  0x37   :  { %105 = dma.vmem_to_hbm [thread:$0]  %s103_s11, 128, %s309_s2, [#allocation4]  }
  0x38   :  { %s203_s23 = scalar_lea.vmem %s113_s12, 128  ;;  %p208_p11 = scmp.lt.s32.totalorder %s113_s12, %s113_s12 }
  0x39   :  { %p204_p10 = scmp.ne.s32.totalorder %s113_s12, %s203_s23  ;;  %p209_p12 = scmp.lt.s32.totalorder %s203_s23, %s203_s23 }
  0x3b   :  { %p210_p13 = por %p209_p12, %p208_p11 }
  0x3d   :  { %p211_p0 = pnand %p210_p13, %p204_p10 }
  0x3f   :  { %214 = shalt.err (!%p211_p0)
}
  0x40   :  { %s215_s26 = scalar_lea.hbm %s310_s3, 128 }
  0x41   :  { %p216_p1 = scmp.ne.s32.totalorder %s310_s3, %s215_s26  ;;  %p219_p2 = scmp.lt.u32.totalorder %s215_s26, %s310_s3 }
  0x43   :  { %p221_p3 = pnand %p219_p2, %p216_p1 }
  0x45   :  { %224 = shalt.err (!%p221_p3)
}
  0x46   :  { %115 = dma.vmem_to_hbm [thread:$0]  %s113_s12, 128, %s310_s3, [#allocation9]  }
  0x47   :  { %229 = dma.done.wait [#allocation4], 128  }
  0x48   :  { %230 = vsyncadd [#allocation4], 4294967168 }
  0x49   :  { %231 = dma.done.wait [#allocation9], 128  }
  0x4a   :  { %232 = vsyncadd [#allocation9], 4294967168 }
  0x4b   :  { %122 = vsyncpa [#allocation3], 1 }
  0x4c   :  { %123 = vsyncpa [#allocation6], 1 }
  0x4d   :  { %124 = vsyncpa [#allocation4], 1 }
  0x4e   :  { %125 = vsyncpa [#allocation9], 1 }

</bundles_post_ra>
